<compile_context>
chip_gen: v5e
topology: v5e:2x2
jax: 0.10.0
libtpu: 0.0.40
codegen_flags: <defaults>
</compile_context>

<pallas_src>
import jax
import jax.numpy as jnp
from jax.experimental import pallas as pl
from jax.experimental.pallas import tpu as pltpu


# ----------------------------- fused kernel ---------------------------------

def resblock_kernel(x_ref, w1_ref, b1_ref, w2e_ref, w2c_ref, bo_ref, out_ref):
    # x_ref  : (Bt, H, W*Cin)           lane-dense input rows (matmul dtype)
    # w1_ref : (3, W*Cin,  W*Cmid)      banded conv1 weights (one matrix per ky)
    # b1_ref : (1, W*Cmid)     f32      conv1 bias tiled over W
    # w2e_ref: (2, W*Cmid, W*Cout)      banded conv2 weights for ky in {0, 2}
    # w2c_ref: (W*(Cmid+Cin), W*Cout)   conv2 ky=1 stacked with 1x1 shortcut (block-diag)
    # bo_ref : (1, W*Cout)     f32      combined output bias (b2 + bs) tiled over W
    # out_ref: (Bt, H, W*Cout) f32
    Bt, H, WCin = x_ref.shape
    WCmid = w1_ref.shape[2]
    WCout = out_ref.shape[2]
    M = Bt * H

    # Rows of Bt images stacked along the sublane (M) axis; lane dim untouched.
    x2 = x_ref[...].reshape(M, WCin)

    # Per-image boundary-row masks for the H-direction (ky) shifts.
    row = jax.lax.broadcasted_iota(jnp.int32, (M, 1), 0)
    rel = jax.lax.rem(row, jnp.int32(H))
    not_first = rel != 0            # rows allowed to receive y[h-1]
    not_last = rel != (H - 1)       # rows allowed to receive y[h+1]

    # ---- conv1 (3x3 'SAME') + bias + ReLU -----------------------------------
    # out[h] = sum_ky x[h+ky-1] @ W1[ky]; the ky shift is a roll of the matmul
    # output (XLU) with the image-boundary rows masked out (implicit zero pad).
    acc1 = jnp.broadcast_to(b1_ref[...], (M, WCmid)).astype(jnp.float32)
    acc1 = acc1 + jnp.dot(x2, w1_ref[1], preferred_element_type=jnp.float32)
    y0 = jnp.dot(x2, w1_ref[0], preferred_element_type=jnp.float32)
    acc1 = acc1 + jnp.where(not_first, pltpu.roll(y0, 1, 0), 0.0)
    y2 = jnp.dot(x2, w1_ref[2], preferred_element_type=jnp.float32)
    acc1 = acc1 + jnp.where(not_last, pltpu.roll(y2, M - 1, 0), 0.0)   # == roll by -1
    h1 = jnp.maximum(acc1, 0.0)                     # f32 elementwise (v5e-safe)

    # ---- conv2 (3x3 'SAME') + 1x1 shortcut + combined bias -------------------
    h1m = h1.astype(w2e_ref.dtype)                  # bf16 MXU operands if requested
    acc2 = jnp.broadcast_to(bo_ref[...], (M, WCout)).astype(jnp.float32)
    # ky=1 of conv2 fused with the 1x1 shortcut: one push with K = W*(Cmid+Cin).
    lhs_c = jnp.concatenate([h1m, x2], axis=1)      # (M, W*Cmid + W*Cin)
    acc2 = acc2 + jnp.dot(lhs_c, w2c_ref[...], preferred_element_type=jnp.float32)
    z0 = jnp.dot(h1m, w2e_ref[0], preferred_element_type=jnp.float32)
    acc2 = acc2 + jnp.where(not_first, pltpu.roll(z0, 1, 0), 0.0)
    z2 = jnp.dot(h1m, w2e_ref[1], preferred_element_type=jnp.float32)
    acc2 = acc2 + jnp.where(not_last, pltpu.roll(z2, M - 1, 0), 0.0)   # == roll by -1

    # Lane-dense store: W*Cout on the lane axis -> unmasked vst.
    out_ref[...] = acc2.reshape(Bt, H, WCout).astype(out_ref.dtype)


# ------------------------- one-time weight packing ---------------------------

def _banded_conv_weights(w, width):
    """HWIO (kh, kw, Cin, Cout) -> (kh, width*Cin, width*Cout) banded matrices.

    B[ky][ix*Cin + c, ox*Cout + k] = w[ky, kx, c, k] with ix = ox + kx - kw//2.
    Out-of-range ix blocks are absent => implicit 'SAME' zero padding along W.
    """
    kh, kw, cin, cout = w.shape
    idx = jnp.arange(width)
    mats = []
    for ky in range(kh):
        m = jnp.zeros((width, cin, width, cout), w.dtype)
        for kx in range(kw):
            band = (idx[:, None] - idx[None, :] == (kx - kw // 2)).astype(w.dtype)
            m = m + band[:, None, :, None] * w[ky, kx][None, :, None, :]
        mats.append(m.reshape(width * cin, width * cout))
    return jnp.stack(mats, axis=0)


def _blockdiag_1x1_weights(ws, width):
    """(Cin, Cout) -> (width*Cin, width*Cout) block-diagonal matrix (1x1 conv)."""
    cin, cout = ws.shape
    eye = jnp.eye(width, dtype=ws.dtype)
    return (eye[:, None, :, None] * ws[None, :, None, :]).reshape(width * cin,
                                                                  width * cout)


def prepare_params(params, width, matmul_dtype=jnp.bfloat16):
    """Build the packed kernel weights ONCE (hoisted out of the per-call path).

    matmul_dtype=jnp.bfloat16 (default) feeds the MXU bf16 operands (v6e/v7x win)
    while the kernel keeps f32 accumulation and a f32 elementwise epilogue.
    """
    w1, b1, w2, b2, ws, bs = params
    w1b = _banded_conv_weights(w1, width).astype(matmul_dtype)          # (3, W*Cin,  W*Cmid)
    w2b = _banded_conv_weights(w2, width)                               # (3, W*Cmid, W*Cout)
    wsb = _blockdiag_1x1_weights(ws, width)                             # (W*Cin,  W*Cout)
    w2e = jnp.stack([w2b[0], w2b[2]], axis=0).astype(matmul_dtype)      # ky in {0, 2}
    w2c = jnp.concatenate([w2b[1], wsb], axis=0).astype(matmul_dtype)   # ky=1 + shortcut
    b1r = jnp.tile(b1.reshape(-1), width).reshape(1, -1).astype(jnp.float32)
    bor = jnp.tile((b2 + bs).reshape(-1), width).reshape(1, -1).astype(jnp.float32)
    return (w1b, b1r, w2e, w2c, bor)


# ------------------------------ wrappers -------------------------------------

def _pick_block_batch(n, h, target_m=512):
    """Largest divisor Bt of n with Bt*h <= max(target_m, h) (folds batch into M)."""
    best = 1
    for bt in range(1, n + 1):
        if n % bt == 0 and bt * h <= max(target_m, h):
            best = bt
    return best


def residual_block_rows(x_rows, packed, *, block_batch=None,
                        vmem_limit_bytes=32 * 1024 * 1024):
    """x_rows: (N, H, W*Cin) in the matmul dtype -> (N, H, W*Cout) f32 (row layout)."""
    w1b, b1r, w2e, w2c, bor = packed
    N, H, WCin = x_rows.shape
    WCmid = w1b.shape[2]
    WCout = w2c.shape[1]
    if block_batch is None:
        block_batch = _pick_block_batch(N, H)
    assert N % block_batch == 0
    grid = (N // block_batch,)

    m_total = N * H
    flops = 2 * m_total * (3 * WCin * WCmid
                           + (WCmid + WCin) * WCout
                           + 2 * WCmid * WCout)
    bytes_accessed = (x_rows.size * x_rows.dtype.itemsize
                      + sum(a.size * a.dtype.itemsize for a in packed)
                      + m_total * WCout * 4)

    return pl.pallas_call(
        resblock_kernel,
        out_shape=jax.ShapeDtypeStruct((N, H, WCout), jnp.float32),
        grid_spec=pltpu.PrefetchScalarGridSpec(
            num_scalar_prefetch=0,
            grid=grid,
            in_specs=[
                pl.BlockSpec((block_batch, H, WCin), lambda n: (n, 0, 0)),
                pl.BlockSpec((3, WCin, WCmid), lambda n: (0, 0, 0)),
                pl.BlockSpec((1, WCmid), lambda n: (0, 0)),
                pl.BlockSpec((2, WCmid, WCout), lambda n: (0, 0, 0)),
                pl.BlockSpec((WCmid + WCin, WCout), lambda n: (0, 0)),
                pl.BlockSpec((1, WCout), lambda n: (0, 0)),
            ],
            out_specs=pl.BlockSpec((block_batch, H, WCout), lambda n: (n, 0, 0)),
        ),
        compiler_params=pltpu.CompilerParams(
            dimension_semantics=("parallel",),
            vmem_limit_bytes=vmem_limit_bytes),
        cost_estimate=pl.CostEstimate(flops=flops, transcendentals=0,
                                      bytes_accessed=bytes_accessed),
    )(x_rows, w1b, b1r, w2e, w2c, bor)


def residual_block_nchw(x_nchw, packed, *, block_batch=None):
    """(N, Cin, H, W) f32 -> (N, Cout, H, W) f32 (matches the PyTorch module layout).

    NOTE: in an end-to-end NHWC / row-layout pipeline use residual_block_rows directly
    and these two transposes disappear; they are kept only for NCHW module parity.
    """
    w1b = packed[0]
    N, Cin, H, W = x_nchw.shape
    Cout = packed[3].shape[1] // W
    x_rows = jnp.transpose(x_nchw, (0, 2, 3, 1)).reshape(N, H, W * Cin)
    x_rows = x_rows.astype(w1b.dtype)
    out_rows = residual_block_rows(x_rows, packed, block_batch=block_batch)
    return jnp.transpose(out_rows.reshape(N, H, W, Cout), (0, 3, 1, 2))


# ------------------------------ reference ------------------------------------

def ref_forward(x_nchw, params):
    """Pure-JAX reference (lax.conv, HIGHEST precision) to validate the kernel."""
    w1, b1, w2, b2, ws, bs = params
    x = jnp.transpose(x_nchw, (0, 2, 3, 1))
    dn = ('NHWC', 'HWIO', 'NHWC')
    hp = jax.lax.Precision.HIGHEST
    h1 = jax.lax.conv_general_dilated(x, w1, (1, 1), 'SAME',
                                      dimension_numbers=dn, precision=hp) + b1[0]
    h1 = jnp.maximum(h1, 0.0)
    main = jax.lax.conv_general_dilated(h1, w2, (1, 1), 'SAME',
                                        dimension_numbers=dn, precision=hp) + b2[0]
    sc = jnp.einsum('nhwc,cd->nhwd', x, ws, precision=hp) + bs[0]
    return jnp.transpose(main + sc, (0, 3, 1, 2))


if __name__ == "__main__":
    key = jax.random.PRNGKey(0)
    N, Cin, H, W = 2, 4, 16, 16
    Cmid, Cout = 8, 8

    k = jax.random.split(key, 7)
    x = jax.random.normal(k[0], (N, Cin, H, W), jnp.float32)
    w1 = jax.random.normal(k[1], (3, 3, Cin, Cmid), jnp.float32) / jnp.sqrt(9 * Cin)
    b1 = jax.random.normal(k[2], (1, Cmid), jnp.float32) * 0.1
    w2 = jax.random.normal(k[3], (3, 3, Cmid, Cout), jnp.float32) / jnp.sqrt(9 * Cmid)
    b2 = jax.random.normal(k[4], (1, Cout), jnp.float32) * 0.1
    ws = jax.random.normal(k[5], (Cin, Cout), jnp.float32) / jnp.sqrt(Cin)
    bs = jax.random.normal(k[6], (1, Cout), jnp.float32) * 0.1
    params = (w1, b1, w2, b2, ws, bs)

    ref = jax.block_until_ready(ref_forward(x, params))
    fwd = jax.jit(residual_block_nchw)

    # f32 MXU operands (module-faithful path).
    packed_f32 = prepare_params(params, W, matmul_dtype=jnp.float32)
    out_f32 = jax.block_until_ready(fwd(x, packed_f32))
    assert out_f32.shape == (N, Cout, H, W), out_f32.shape
    assert jnp.allclose(out_f32, ref, atol=5e-3, rtol=5e-3), \
        float(jnp.max(jnp.abs(out_f32 - ref)))

    # bf16 MXU operands, f32 accumulation (default; v6e / v7x fast path).
    packed_bf16 = prepare_params(params, W)                 # matmul_dtype=bfloat16
    out_bf16 = jax.block_until_ready(fwd(x, packed_bf16))
    assert jnp.allclose(out_bf16, ref, atol=3e-2, rtol=3e-2), \
        float(jnp.max(jnp.abs(out_bf16 - ref)))

    print("KERNEL_OK")
</pallas_src>

<mosaic_0001>
module attributes {stable_mosaic.version = 11 : i64} {
  func.func @resblock_kernel(%arg0: i32, %arg1: memref<2x16x64xf32, #tpu.memory_space<vmem>>, %arg2: memref<3x64x128xf32, #tpu.memory_space<vmem>>, %arg3: memref<1x128xf32, #tpu.memory_space<vmem>>, %arg4: memref<2x128x128xf32, #tpu.memory_space<vmem>>, %arg5: memref<192x128xf32, #tpu.memory_space<vmem>>, %arg6: memref<1x128xf32, #tpu.memory_space<vmem>>, %arg7: memref<2x16x128xf32, #tpu.memory_space<vmem>>) attributes {dimension_semantics = [#tpu.dimension_semantics<parallel>], iteration_bounds = array<i64: 1>, scalar_prefetch = 0 : i64, scratch_operands = 0 : i64, tpu.core_type = #tpu.core_type<tc>, window_params = [{transform_indices = @transform_0, window_bounds = array<i64: 2, 16, 64>}, {pipeline_mode = #tpu.pipeline_mode<synchronous>, transform_indices = @transform_1, window_bounds = array<i64: 3, 64, 128>}, {pipeline_mode = #tpu.pipeline_mode<synchronous>, transform_indices = @transform_2, window_bounds = array<i64: 1, 128>}, {pipeline_mode = #tpu.pipeline_mode<synchronous>, transform_indices = @transform_3, window_bounds = array<i64: 2, 128, 128>}, {pipeline_mode = #tpu.pipeline_mode<synchronous>, transform_indices = @transform_4, window_bounds = array<i64: 192, 128>}, {pipeline_mode = #tpu.pipeline_mode<synchronous>, transform_indices = @transform_5, window_bounds = array<i64: 1, 128>}, {transform_indices = @transform_6, window_bounds = array<i64: 2, 16, 128>}]} {
    %c0 = arith.constant 0 : index
    %c0_0 = arith.constant 0 : index
    %c0_1 = arith.constant 0 : index
    %0 = vector.load %arg1[%c0, %c0_0, %c0_1] : memref<2x16x64xf32, #tpu.memory_space<vmem>>, vector<2x16x64xf32>
    %1 = vector.shape_cast %0 : vector<2x16x64xf32> to vector<32x64xf32>
    %2 = tpu.iota {dimensions = array<i32: 0>} : vector<32x1xi32>
    %c16_i32 = arith.constant 16 : i32
    %3 = vector.broadcast %c16_i32 : i32 to vector<32x1xi32>
    %4 = arith.remsi %2, %3 : vector<32x1xi32>
    %c0_i32 = arith.constant 0 : i32
    %5 = vector.broadcast %c0_i32 : i32 to vector<32x1xi32>
    %6 = arith.cmpi ne, %4, %5 : vector<32x1xi32>
    %c15_i32 = arith.constant 15 : i32
    %7 = vector.broadcast %c15_i32 : i32 to vector<32x1xi32>
    %8 = arith.cmpi ne, %4, %7 : vector<32x1xi32>
    %c0_2 = arith.constant 0 : index
    %c0_3 = arith.constant 0 : index
    %9 = vector.load %arg3[%c0_2, %c0_3] : memref<1x128xf32, #tpu.memory_space<vmem>>, vector<1x128xf32>
    %10 = vector.shape_cast %9 : vector<1x128xf32> to vector<1x128xf32>
    %11 = vector.broadcast %10 : vector<1x128xf32> to vector<32x128xf32>
    %c1 = arith.constant 1 : index
    %c0_4 = arith.constant 0 : index
    %c0_5 = arith.constant 0 : index
    %12 = vector.load %arg2[%c1, %c0_4, %c0_5] : memref<3x64x128xf32, #tpu.memory_space<vmem>>, vector<1x64x128xf32>
    %13 = vector.shape_cast %12 : vector<1x64x128xf32> to vector<64x128xf32>
    %cst = arith.constant dense<0.000000e+00> : vector<32x128xf32>
    %14 = tpu.matmul %1, %13, %cst {dimension_numbers = #tpu.dot_dimension_numbers<[1], [0], [0], [1], [0, 0, 1, 1], [], []>} : vector<32x64xf32>, vector<64x128xf32>, vector<32x128xf32> -> vector<32x128xf32>
    %15 = arith.addf %11, %14 : vector<32x128xf32>
    %c0_6 = arith.constant 0 : index
    %c0_7 = arith.constant 0 : index
    %c0_8 = arith.constant 0 : index
    %16 = vector.load %arg2[%c0_6, %c0_7, %c0_8] : memref<3x64x128xf32, #tpu.memory_space<vmem>>, vector<1x64x128xf32>
    %17 = vector.shape_cast %16 : vector<1x64x128xf32> to vector<64x128xf32>
    %cst_9 = arith.constant dense<0.000000e+00> : vector<32x128xf32>
    %18 = tpu.matmul %1, %17, %cst_9 {dimension_numbers = #tpu.dot_dimension_numbers<[1], [0], [0], [1], [0, 0, 1, 1], [], []>} : vector<32x64xf32>, vector<64x128xf32>, vector<32x128xf32> -> vector<32x128xf32>
    %c1_i32 = arith.constant 1 : i32
    %19 = tpu.dynamic_rotate %18 by %c1_i32 dim 0 : vector<32x128xf32>, i32 -> vector<32x128xf32>
    %cst_10 = arith.constant 0.000000e+00 : f32
    %20 = vector.shape_cast %6 : vector<32x1xi1> to vector<32x1xi1>
    %21 = vector.broadcast %20 : vector<32x1xi1> to vector<32x128xi1>
    %22 = vector.broadcast %cst_10 : f32 to vector<32x128xf32>
    %23 = arith.select %21, %19, %22 : vector<32x128xi1>, vector<32x128xf32>
    %24 = arith.addf %15, %23 : vector<32x128xf32>
    %c2 = arith.constant 2 : index
    %c0_11 = arith.constant 0 : index
    %c0_12 = arith.constant 0 : index
    %25 = vector.load %arg2[%c2, %c0_11, %c0_12] : memref<3x64x128xf32, #tpu.memory_space<vmem>>, vector<1x64x128xf32>
    %26 = vector.shape_cast %25 : vector<1x64x128xf32> to vector<64x128xf32>
    %cst_13 = arith.constant dense<0.000000e+00> : vector<32x128xf32>
    %27 = tpu.matmul %1, %26, %cst_13 {dimension_numbers = #tpu.dot_dimension_numbers<[1], [0], [0], [1], [0, 0, 1, 1], [], []>} : vector<32x64xf32>, vector<64x128xf32>, vector<32x128xf32> -> vector<32x128xf32>
    %c31_i32 = arith.constant 31 : i32
    %28 = tpu.dynamic_rotate %27 by %c31_i32 dim 0 : vector<32x128xf32>, i32 -> vector<32x128xf32>
    %cst_14 = arith.constant 0.000000e+00 : f32
    %29 = vector.shape_cast %8 : vector<32x1xi1> to vector<32x1xi1>
    %30 = vector.broadcast %29 : vector<32x1xi1> to vector<32x128xi1>
    %31 = vector.broadcast %cst_14 : f32 to vector<32x128xf32>
    %32 = arith.select %30, %28, %31 : vector<32x128xi1>, vector<32x128xf32>
    %33 = arith.addf %24, %32 : vector<32x128xf32>
    %cst_15 = arith.constant 0.000000e+00 : f32
    %34 = vector.broadcast %cst_15 : f32 to vector<32x128xf32>
    %35 = arith.maximumf %33, %34 : vector<32x128xf32>
    %c0_16 = arith.constant 0 : index
    %c0_17 = arith.constant 0 : index
    %36 = vector.load %arg6[%c0_16, %c0_17] : memref<1x128xf32, #tpu.memory_space<vmem>>, vector<1x128xf32>
    %37 = vector.shape_cast %36 : vector<1x128xf32> to vector<1x128xf32>
    %38 = vector.broadcast %37 : vector<1x128xf32> to vector<32x128xf32>
    %39 = tpu.concatenate %35, %1 in 1 : vector<32x128xf32>, vector<32x64xf32> -> vector<32x192xf32>
    %c0_18 = arith.constant 0 : index
    %c0_19 = arith.constant 0 : index
    %40 = vector.load %arg5[%c0_18, %c0_19] : memref<192x128xf32, #tpu.memory_space<vmem>>, vector<192x128xf32>
    %cst_20 = arith.constant dense<0.000000e+00> : vector<32x128xf32>
    %41 = tpu.matmul %39, %40, %cst_20 {dimension_numbers = #tpu.dot_dimension_numbers<[1], [0], [0], [1], [0, 0, 1, 1], [], []>} : vector<32x192xf32>, vector<192x128xf32>, vector<32x128xf32> -> vector<32x128xf32>
    %42 = arith.addf %38, %41 : vector<32x128xf32>
    %c0_21 = arith.constant 0 : index
    %c0_22 = arith.constant 0 : index
    %c0_23 = arith.constant 0 : index
    %43 = vector.load %arg4[%c0_21, %c0_22, %c0_23] : memref<2x128x128xf32, #tpu.memory_space<vmem>>, vector<1x128x128xf32>
    %44 = vector.shape_cast %43 : vector<1x128x128xf32> to vector<128x128xf32>
    %cst_24 = arith.constant dense<0.000000e+00> : vector<32x128xf32>
    %45 = tpu.matmul %35, %44, %cst_24 {dimension_numbers = #tpu.dot_dimension_numbers<[1], [0], [0], [1], [0, 0, 1, 1], [], []>} : vector<32x128xf32>, vector<128x128xf32>, vector<32x128xf32> -> vector<32x128xf32>
    %c1_i32_25 = arith.constant 1 : i32
    %46 = tpu.dynamic_rotate %45 by %c1_i32_25 dim 0 : vector<32x128xf32>, i32 -> vector<32x128xf32>
    %cst_26 = arith.constant 0.000000e+00 : f32
    %47 = vector.shape_cast %6 : vector<32x1xi1> to vector<32x1xi1>
    %48 = vector.broadcast %47 : vector<32x1xi1> to vector<32x128xi1>
    %49 = vector.broadcast %cst_26 : f32 to vector<32x128xf32>
    %50 = arith.select %48, %46, %49 : vector<32x128xi1>, vector<32x128xf32>
    %51 = arith.addf %42, %50 : vector<32x128xf32>
    %c1_27 = arith.constant 1 : index
    %c0_28 = arith.constant 0 : index
    %c0_29 = arith.constant 0 : index
    %52 = vector.load %arg4[%c1_27, %c0_28, %c0_29] : memref<2x128x128xf32, #tpu.memory_space<vmem>>, vector<1x128x128xf32>
    %53 = vector.shape_cast %52 : vector<1x128x128xf32> to vector<128x128xf32>
    %cst_30 = arith.constant dense<0.000000e+00> : vector<32x128xf32>
    %54 = tpu.matmul %35, %53, %cst_30 {dimension_numbers = #tpu.dot_dimension_numbers<[1], [0], [0], [1], [0, 0, 1, 1], [], []>} : vector<32x128xf32>, vector<128x128xf32>, vector<32x128xf32> -> vector<32x128xf32>
    %c31_i32_31 = arith.constant 31 : i32
    %55 = tpu.dynamic_rotate %54 by %c31_i32_31 dim 0 : vector<32x128xf32>, i32 -> vector<32x128xf32>
    %cst_32 = arith.constant 0.000000e+00 : f32
    %56 = vector.shape_cast %8 : vector<32x1xi1> to vector<32x1xi1>
    %57 = vector.broadcast %56 : vector<32x1xi1> to vector<32x128xi1>
    %58 = vector.broadcast %cst_32 : f32 to vector<32x128xf32>
    %59 = arith.select %57, %55, %58 : vector<32x128xi1>, vector<32x128xf32>
    %60 = arith.addf %51, %59 : vector<32x128xf32>
    %61 = vector.shape_cast %60 : vector<32x128xf32> to vector<2x16x128xf32>
    %c0_33 = arith.constant 0 : index
    %c0_34 = arith.constant 0 : index
    %c0_35 = arith.constant 0 : index
    %62 = vector.load %arg7[%c0_33, %c0_34, %c0_35] : memref<2x16x128xf32, #tpu.memory_space<vmem>>, vector<2x16x128xf32>
    tpu.vector_store %arg7[%c0_33, %c0_34, %c0_35], %61 {strides = array<i32>} : memref<2x16x128xf32, #tpu.memory_space<vmem>>, vector<2x16x128xf32>,
    return
  }
  func.func @transform_0(%arg0: i32) -> (i32, i32, i32) {
    %c0_i32 = arith.constant 0 : i32
    %c0_i32_0 = arith.constant 0 : i32
    %c0_i32_1 = arith.constant 0 : i32
    return %arg0, %c0_i32, %c0_i32_0 : i32, i32, i32
  }
  func.func @transform_1(%arg0: i32) -> (i32, i32, i32) {
    %c0_i32 = arith.constant 0 : i32
    %c0_i32_0 = arith.constant 0 : i32
    %c0_i32_1 = arith.constant 0 : i32
    %c0_i32_2 = arith.constant 0 : i32
    return %c0_i32, %c0_i32_0, %c0_i32_1 : i32, i32, i32
  }
  func.func @transform_2(%arg0: i32) -> (i32, i32) {
    %c0_i32 = arith.constant 0 : i32
    %c0_i32_0 = arith.constant 0 : i32
    %c0_i32_1 = arith.constant 0 : i32
    return %c0_i32, %c0_i32_0 : i32, i32
  }
  func.func @transform_3(%arg0: i32) -> (i32, i32, i32) {
    %c0_i32 = arith.constant 0 : i32
    %c0_i32_0 = arith.constant 0 : i32
    %c0_i32_1 = arith.constant 0 : i32
    %c0_i32_2 = arith.constant 0 : i32
    return %c0_i32, %c0_i32_0, %c0_i32_1 : i32, i32, i32
  }
  func.func @transform_4(%arg0: i32) -> (i32, i32) {
    %c0_i32 = arith.constant 0 : i32
    %c0_i32_0 = arith.constant 0 : i32
    %c0_i32_1 = arith.constant 0 : i32
    return %c0_i32, %c0_i32_0 : i32, i32
  }
  func.func @transform_5(%arg0: i32) -> (i32, i32) {
    %c0_i32 = arith.constant 0 : i32
    %c0_i32_0 = arith.constant 0 : i32
    %c0_i32_1 = arith.constant 0 : i32
    return %c0_i32, %c0_i32_0 : i32, i32
  }
  func.func @transform_6(%arg0: i32) -> (i32, i32, i32) {
    %c0_i32 = arith.constant 0 : i32
    %c0_i32_0 = arith.constant 0 : i32
    %c0_i32_1 = arith.constant 0 : i32
    return %arg0, %c0_i32, %c0_i32_0 : i32, i32, i32
  }
}

</mosaic_0001>

<bundles_post_ra>
// kernel: residual_block_nchw.1
= control target key start
LH: loop header
LB: loop body
LE: loop exit
PB: predicated region body
PF: predicated region fallthrough
CT: control target
= control target key end

     0   :  { %11 = vsyncpa [#allocation3], 0  ;;  %s887_s0 = inlined_call_operand.vmem [shape: f32[2,16,64], index: 0, kind: input, shape index: {}]   ;;  %s888_s1 = inlined_call_operand.hbm [shape: f32[3,64,128], index: 1, kind: input, shape index: {}]   ;;  %s889_s2 = inlined_call_operand.vmem [shape: f32[1,128], index: 2, kind: input, shape index: {}]   ;;  %s890_s3 = inlined_call_operand.vmem [shape: f32[2,128,128], index: 3, kind: input, shape index: {}]   ;;  %s891_s4 = inlined_call_operand.hbm [shape: f32[192,128], index: 4, kind: input, shape index: {}]   ;;  %s892_s5 = inlined_call_operand.vmem [shape: f32[1,128], index: 5, kind: input, shape index: {}]   ;;  %s893_s6 = inlined_call_operand.vmem [shape: f32[2,16,128], index: 6, kind: output, shape index: {}]  }
   0x1   :  { %s19_s23 = sshll.u32 %s888_s1, 4  ;;  %s20_s23 = int_to_ptr.hbm [resolvable:$true] %s19_s23 }
   0x2   :  { %12 = vsyncpa [#allocation5], 0  ;;  %s601_s24 = smov [#allocation2]   ;;  %s36_s28 = sshll.u32 %s891_s4, 4  ;;  %s37_s28 = int_to_ptr.hbm [resolvable:$true] %s36_s28 }
   0x3   :  { %s21_s25 = sshll.u32 %s601_s24, 4  ;;  %s602_s29 = smov 128   ;;  %s22_s25 = int_to_ptr.vmem [resolvable:$true] %s21_s25 }
   0x4   :  { %s603_s30 = smov 8   ;;  %s604_s7 = smov [#allocation4]  }
   0x5   :  { %27 = dma.hbm_to_vmem [thread:$0]  %s20_s23, 3072, %s22_s25, [#allocation3], %s602_s29, %s602_s29, %s603_s30  }
   0x6   :  { %s38_s8 = sshll.u32 %s604_s7, 4  ;;  %s39_s8 = int_to_ptr.vmem [resolvable:$true] %s38_s8 }
   0x7   :  { %44 = dma.hbm_to_vmem [thread:$0]  %s37_s28, 3072, %s39_s8, [#allocation5], %s602_s29, %s602_s29, %s603_s30  }
   0x8   :  { %597 = dma.done.wait [#allocation3], 3072  }
   0x9   :  { %598 = vsyncadd [#allocation3], 4294964224 }
   0xa   :  { %599 = dma.done.wait [#allocation5], 3072  }
   0xb   :  { %600 = vsyncadd [#allocation5], 4294964224  ;;  %v166_v0 = vld [vmem:[#allocation2 + $0x38] sm:$0xff]  ;;  %v165_v3 = vld [vmem:[#allocation2 + $0x30] sm:$0xff]  ;;  %vm113_vm0 = vcmask 523264  }
   0xc   :  { %v229_v1 = vld [vmem:[#allocation2 + $0xb8] sm:$0xff]  ;;  %175 = vmatpush.msra.mxu1 %v166_v0  ;;  %v228_v4 = vld [vmem:[#allocation2 + $0xb0] sm:$0xff]  ;;  %v164_v6 = vld [vmem:[#allocation2 + $0x28] sm:$0xff] }
   0xd   :  { %v112_v2 = vld [vmem:[#allocation2 + $0x78] sm:$0xff]  ;;  %238 = vmatpush.msra.mxu2 %v229_v1  ;;  %v111_v5 = vld [vmem:[#allocation2 + $0x70] sm:$0xff]  ;;  %v227_v7 = vld [vmem:[#allocation2 + $0xa8] sm:$0xff] }
   0xe   :  { %134 = vmatpush.msra.mxu0 %v112_v2  ;;  %176 = vmatpush.msra.mxu1 %v165_v3  ;;  %v110_v8 = vld [vmem:[#allocation2 + $0x68] sm:$0xff]  ;;  %v163_v9 = vld [vmem:[#allocation2 + $0x20] sm:$0xff]  ;;  %v162_v12 = vld [vmem:[#allocation2 + $0x18] sm:$0xff] }
   0xf   :  { %239 = vmatpush.msra.mxu2 %v228_v4  ;;  %v226_v10 = vld [vmem:[#allocation2 + $0xa0] sm:$0xff]  ;;  %v225_v13 = vld [vmem:[#allocation2 + $0x98] sm:$0xff]  ;;  %v161_v15 = vld [vmem:[#allocation2 + $0x10] sm:$0xff] }
  0x10   :  { %135 = vmatpush.msra.mxu0 %v111_v5  ;;  %177 = vmatpush.msra.mxu1 %v164_v6  ;;  %v109_v11 = vld [vmem:[#allocation2 + $0x60] sm:$0xff]  ;;  %v108_v14 = vld [vmem:[#allocation2 + $0x58] sm:$0xff]  ;;  %v224_v16 = vld [vmem:[#allocation2 + $0x90] sm:$0xff] }
  0x11   :  { %240 = vmatpush.msra.mxu2 %v227_v7  ;;  %v107_v17 = vld [vmem:[#allocation2 + $0x50] sm:$0xff]  ;;  %v160_v18 = vld [vmem:[#allocation2 + $0x8] sm:$0xff]  ;;  %v159_v21 = vld [vmem:[#allocation2] sm:$0xff] }
  0x12   :  { %136 = vmatpush.msra.mxu0 %v110_v8  ;;  %178 = vmatpush.msra.mxu1 %v163_v9  ;;  %v223_v19 = vld [vmem:[#allocation2 + $0x88] sm:$0xff]  ;;  %v222_v22 = vld [vmem:[#allocation2 + $0x80] sm:$0xff]  ;;  %v671_v26 = vld [vmem:[%s887_s0 + $0x10] sm:$0xff] }
  0x13   :  { %241 = vmatpush.msra.mxu2 %v226_v10  ;;  %v106_v20 = vld [vmem:[#allocation2 + $0x48] sm:$0xff]  ;;  %v105_v23 = vld [vmem:[#allocation2 + $0x40] sm:$0xff]  ;;  %v682_v27 = vld [vmem:[%s887_s0 + $0x18] sm:$0xff] }
  0x14   :  { %137 = vmatpush.msra.mxu0 %v109_v11  ;;  %179 = vmatpush.msra.mxu1 %v162_v12  ;;  %v649_v24 = vld [vmem:[%s887_s0] sm:$0xff]  ;;  %v660_v25 = vld [vmem:[%s887_s0 + $0x8] sm:$0xff]  ;;  %v307_v28 = vld [vmem:[#allocation4 + $0x78] sm:$0xff] }
  0x15   :  { %242 = vmatpush.msra.mxu2 %v225_v13  ;;  %v393_v29 = vld [vmem:[%s890_s3 + $0x78] sm:$0xff]  ;;  %316 = vmatpush.msra.mxu3 %v307_v28  ;;  %v306_v31 = vld [vmem:[#allocation4 + $0x70] sm:$0xff]  ;;  %v305_v34 = vld [vmem:[#allocation4 + $0x68] sm:$0xff]  ;;  %v59_v28 = vlaneseq }
  0x16   :  { %138 = vmatpush.msra.mxu0 %v108_v14  ;;  %180 = vmatpush.msra.mxu1 %v161_v15  ;;  %v542_v30 = vld [vmem:[%s890_s3 + $0xf8] sm:$0xff]  ;;  %v392_v32 = vld [vmem:[%s890_s3 + $0x70] sm:$0xff]  ;;  %v391_v35 = vld [vmem:[%s890_s3 + $0x68] sm:$0xff] }
  0x17   :  { %243 = vmatpush.msra.mxu2 %v224_v16  ;;  %v541_v33 = vld [vmem:[%s890_s3 + $0xf0] sm:$0xff]  ;;  %317 = vmatpush.msra.mxu3 %v306_v31  ;;  %v540_v36 = vld [vmem:[%s890_s3 + $0xe8] sm:$0xff]  ;;  %v304_v37 = vld [vmem:[#allocation4 + $0x60] sm:$0xff]  ;;  %v792_v31 = vshrl.u32 %v59_v28, 7 }
  0x18   :  { %139 = vmatpush.msra.mxu0 %v107_v17  ;;  %181 = vmatpush.msra.mxu1 %v160_v18  ;;  %v390_v38 = vld [vmem:[%s890_s3 + $0x60] sm:$0xff]  ;;  %v315_v40 = vld [vmem:[#allocation4 + $0xb8] sm:$0xff]  ;;  %v314_v44 = vld [vmem:[#allocation4 + $0xb0] sm:$0xff] }
  0x19   :  { %244 = vmatpush.msra.mxu2 %v223_v19  ;;  %318 = vmatpush.msra.mxu3 %v305_v34  ;;  %v539_v39 = vld [vmem:[%s890_s3 + $0xe0] sm:$0xff]  ;;  %v303_v41 = vld [vmem:[#allocation4 + $0x58] sm:$0xff]  ;;  %v302_v45 = vld [vmem:[#allocation4 + $0x50] sm:$0xff]  ;;  %v61_v34 = vadd.s32 8, %v792_v31  ;;  %vm200_vm2 = vcmp.lt.s32.totalorder %v792_v31, 1  ;;  %vm263_vm3 = vcmp.lt.s32.totalorder %v792_v31, 7 }
  0x1a   :  { %140 = vmatpush.msra.mxu0 %v106_v20  ;;  %182 = vmatpush.msra.mxu1 %v159_v21  ;;  %v389_v42 = vld [vmem:[%s890_s3 + $0x58] sm:$0xff]  ;;  %v388_v46 = vld [vmem:[%s890_s3 + $0x50] sm:$0xff]  ;;  %v301_v48 = vld [vmem:[#allocation4 + $0x48] sm:$0xff] }
  0x1b   :  { %245 = vmatpush.msra.mxu2 %v222_v22  ;;  %515 = vmatmul.msk.f32.vlgmr.msra.gmra.mxu1 %vm113_vm0, %v649_v24  ;;  %v538_v43 = vld [vmem:[%s890_s3 + $0xd8] sm:$0xff]  ;;  %v537_v47 = vld [vmem:[%s890_s3 + $0xd0] sm:$0xff]  ;;  %v387_v49 = vld [vmem:[%s890_s3 + $0x48] sm:$0xff] }
  0x1c   :  { %141 = vmatpush.msra.mxu0 %v105_v23  ;;  %519 = vmatmul.msk.f32.vlgmr.msra.gmra.mxu2 %vm113_vm0, %v649_v24  ;;  %v536_v50 = vld [vmem:[%s890_s3 + $0xc8] sm:$0xff]  ;;  %v300_v51 = vld [vmem:[#allocation4 + $0x40] sm:$0xff]  ;;  %v299_v54 = vld [vmem:[#allocation4 + $0x38] sm:$0xff] }
  0x1d   :  { %511 = vmatmul.msk.f32.vlgmr.msra.gmra.mxu0 %vm113_vm0, %v649_v24  ;;  %394 = vmatpush.msrb.mxu1 %v393_v29  ;;  %v386_v52 = vld [vmem:[%s890_s3 + $0x40] sm:$0xff]  ;;  %v385_v55 = vld [vmem:[%s890_s3 + $0x38] sm:$0xff]  ;;  %v313_v57 = vld [vmem:[#allocation4 + $0xa8] sm:$0xff] }
  0x1e   :  { %456 = vmatpush.msrb.mxu2 %v542_v30  ;;  %319 = vmatpush.msra.mxu3 %v304_v37  ;;  %v535_v53 = vld [vmem:[%s890_s3 + $0xc0] sm:$0xff]  ;;  %v534_v56 = vld [vmem:[%s890_s3 + $0xb8] sm:$0xff]  ;;  %v298_v59 = vld [vmem:[#allocation4 + $0x30] sm:$0xff] }
  0x1f   :  { %395 = vmatpush.msrb.mxu1 %v392_v32  ;;  %353 = vmatpush.msrb.mxu0 %v315_v40  ;;  %v312_v58 = vld [vmem:[#allocation4 + $0xa0] sm:$0xff]  ;;  %v384_v60 = vld [vmem:[%s890_s3 + $0x30] sm:$0xff]  ;;  %v297_v62 = vld [vmem:[#allocation4 + $0x28] sm:$0xff]  ;;  %v68_v32 = vand.u32 15, %v792_v31 }
  0x20   :  { %457 = vmatpush.msrb.mxu2 %v541_v33  ;;  %320 = vmatpush.msra.mxu3 %v303_v41  ;;  %v533_v61 = vld [vmem:[%s890_s3 + $0xb0] sm:$0xff]  ;;  %v383_v63 = vld [vmem:[%s890_s3 + $0x28] sm:$0xff]  ;;  %v296_v1 = vld [vmem:[#allocation4 + $0x20] sm:$0xff] }
  0x21   :  { %396 = vmatpush.msrb.mxu1 %v391_v35  ;;  %354 = vmatpush.msrb.mxu0 %v314_v44  ;;  %v532_v0 = vld [vmem:[%s890_s3 + $0xa8] sm:$0xff]  ;;  %v382_v2 = vld [vmem:[%s890_s3 + $0x20] sm:$0xff]  ;;  %v311_v4 = vld [vmem:[#allocation4 + $0x98] sm:$0xff]  ;;  %vm801_vm1 = vcmp.ne.s32.totalorder %v68_v32, 0 }
  0x22   :  { %458 = vmatpush.msrb.mxu2 %v540_v36  ;;  %321 = vmatpush.msra.mxu3 %v302_v45  ;;  %v531_v3 = vld [vmem:[%s890_s3 + $0xa0] sm:$0xff]  ;;  %v295_v5 = vld [vmem:[#allocation4 + $0x18] sm:$0xff]  ;;  %v310_v8 = vld [vmem:[#allocation4 + $0x90] sm:$0xff] }
  0x23   :  { %516 = vmatmul.msk.f32.gmra.mxu1 %vm113_vm0, %v660_v25  ;;  %355 = vmatpush.msrb.mxu0 %v313_v57  ;;  %v381_v6 = vld [vmem:[%s890_s3 + $0x18] sm:$0xff]  ;;  %v294_v9 = vld [vmem:[#allocation4 + $0x10] sm:$0xff]  ;;  %v293_v13 = vld [vmem:[#allocation4 + $0x8] sm:$0xff] }
  0x24   :  { %520 = vmatmul.msk.f32.gmra.mxu2 %vm113_vm0, %v660_v25  ;;  %397 = vmatpush.msrb.mxu1 %v390_v38  ;;  %v530_v7 = vld [vmem:[%s890_s3 + $0x98] sm:$0xff]  ;;  %v380_v10 = vld [vmem:[%s890_s3 + $0x10] sm:$0xff]  ;;  %v379_v14 = vld [vmem:[%s890_s3 + $0x8] sm:$0xff] }
  0x25   :  { %512 = vmatmul.msk.f32.gmra.mxu0 %vm113_vm0, %v660_v25  ;;  %459 = vmatpush.msrb.mxu2 %v539_v39  ;;  %v529_v11 = vld [vmem:[%s890_s3 + $0x90] sm:$0xff]  ;;  %v528_v15 = vld [vmem:[%s890_s3 + $0x88] sm:$0xff]  ;;  %v292_v17 = vld [vmem:[#allocation4] sm:$0xff] }
  0x26   :  { %398 = vmatpush.msrb.mxu1 %v389_v42  ;;  %322 = vmatpush.msra.mxu3 %v301_v48  ;;  %v309_v16 = vld [vmem:[#allocation4 + $0x88] sm:$0xff]  ;;  %v378_v18 = vld [vmem:[%s890_s3] sm:$0xff] }
  0x27   :  { %460 = vmatpush.msrb.mxu2 %v538_v43  ;;  %356 = vmatpush.msrb.mxu0 %v312_v58  ;;  %v527_v19 = vld [vmem:[%s890_s3 + $0x80] sm:$0xff]  ;;  %v75_v43 = vand.u32 15, %v61_v34 }
  0x28   :  { %399 = vmatpush.msrb.mxu1 %v388_v46  ;;  %323 = vmatpush.msra.mxu3 %v300_v51  ;;  %v308_v20 = vld [vmem:[#allocation4 + $0x80] sm:$0xff]  ;;  %v62_v46 = vadd.s32 16, %v792_v31 }
  0x29   :  { %461 = vmatpush.msrb.mxu2 %v537_v47  ;;  %357 = vmatpush.msrb.mxu0 %v311_v4  ;;  %vm819_vm4 = vcmp.ne.s32.totalorder %v75_v43, 15 }
  0x2a   :  { %400 = vmatpush.msrb.mxu1 %v387_v49  ;;  %324 = vmatpush.msra.mxu3 %v299_v54 }
  0x2b   :  { %517 = vmatmul.msk.f32.gmra.mxu1 %vm113_vm0, %v671_v26  ;;  %462 = vmatpush.msrb.mxu2 %v536_v50 }
  0x2c   :  { %521 = vmatmul.msk.f32.gmra.mxu2 %vm113_vm0, %v671_v26  ;;  %401 = vmatpush.msrb.mxu1 %v386_v52 }
  0x2d   :  { %513 = vmatmul.msk.f32.gmra.mxu0 %vm113_vm0, %v671_v26  ;;  %463 = vmatpush.msrb.mxu2 %v535_v53 }
  0x2e   :  { %402 = vmatpush.msrb.mxu1 %v385_v55  ;;  %325 = vmatpush.msra.mxu3 %v298_v59  ;;  %v82_v55 = vand.u32 15, %v62_v46 }
  0x2f   :  { %464 = vmatpush.msrb.mxu2 %v534_v56  ;;  %358 = vmatpush.msrb.mxu0 %v310_v8 }
  0x30   :  { %403 = vmatpush.msrb.mxu1 %v384_v60  ;;  %326 = vmatpush.msra.mxu3 %v297_v62  ;;  %vm827_vm5 = vcmp.ne.s32.totalorder %v82_v55, 0 }
  0x31   :  { %465 = vmatpush.msrb.mxu2 %v533_v61  ;;  %359 = vmatpush.msrb.mxu0 %v309_v16 }
  0x32   :  { %404 = vmatpush.msrb.mxu1 %v383_v63  ;;  %327 = vmatpush.msra.mxu3 %v296_v1  ;;  %v63_v1 = vadd.s32 24, %v792_v31 }
  0x33   :  { %518 = vmatmul.msk.f32.gmra.mxu1 %vm113_vm0, %v682_v27  ;;  %466 = vmatpush.msrb.mxu2 %v532_v0 }
  0x34   :  { %522 = vmatmul.msk.f32.gmra.mxu2 %vm113_vm0, %v682_v27  ;;  %405 = vmatpush.msrb.mxu1 %v382_v2 }
  0x35   :  { %514 = vmatmul.msk.f32.gmra.mxu0 %vm113_vm0, %v682_v27  ;;  %467 = vmatpush.msrb.mxu2 %v531_v3 }
  0x36   :  { %328 = vmatpush.msra.mxu3 %v295_v5  ;;  %406 = vmatpush.msrb.mxu1 %v381_v6  ;;  %v89_v6 = vand.u32 15, %v63_v1 }
  0x37   :  { %468 = vmatpush.msrb.mxu2 %v530_v7  ;;  %360 = vmatpush.msrb.mxu0 %v308_v20 }
  0x38   :  { %329 = vmatpush.msra.mxu3 %v294_v9  ;;  %407 = vmatpush.msrb.mxu1 %v380_v10  ;;  %vm840_vm6 = vcmp.ne.s32.totalorder %v89_v6, 15 }
  0x39   :  { %469 = vmatpush.msrb.mxu2 %v529_v11 }
  0x3a   :  { %330 = vmatpush.msra.mxu3 %v293_v13  ;;  %408 = vmatpush.msrb.mxu1 %v379_v14 }
  0x3b   :  { %470 = vmatpush.msrb.mxu2 %v528_v15 }
  0x3c   :  { %331 = vmatpush.msra.mxu3 %v292_v17  ;;  %409 = vmatpush.msrb.mxu1 %v378_v18 }
  0x3d   :  { %471 = vmatpush.msrb.mxu2 %v527_v19  ;;  %523 = vmatmul.msk.f32.vlgmr.msrb.gmra.mxu0 %vm113_vm0, %v649_v24  ;;  %v547_v24 = vld [vmem:[%s889_s2] ss:$0 sm:$0xff] }
  0x45   :  { %524 = vmatmul.msk.f32.gmra.mxu0 %vm113_vm0, %v660_v25 }
  0x4d   :  { %525 = vmatmul.msk.f32.gmra.mxu0 %vm113_vm0, %v671_v26 }
  0x55   :  { %526 = vmatmul.msk.f32.gmra.mxu0 %vm113_vm0, %v682_v27 }
  0x98   :  { %v184_v12 = vpop.f32.mrf.mxu1 }
  0x99   :  { %v196_v25 = vrot.slane %v184_v12, 7 }
  0x9a   :  { %v143_v23 = vpop.f32.mrf.mxu0 }
  0x9b   :  { %v155_v37 = vadd.f32 %v547_v24, %v143_v23 }
  0x9f   :  { %v788_v21 = vpop.f32.mrf.mxu2 }
  0xa0   :  { %v187_v22 = vpop.f32.mrf.mxu1  ;;  %v259_v40 = vrot.slane %v788_v21, 1 }
  0xa1   :  { %v197_v44 = vrot.slane %v187_v22, 7 }
  0xa2   :  { %v146_v33 = vpop.f32.mrf.mxu0 }
  0xa3   :  { %v156_v49 = vadd.f32 %v547_v24, %v146_v33  ;;  %v203_v53 = vsel %vm200_vm2, %v196_v25, %v197_v44  ;;  %v548_v33 = vld [vmem:[%s892_s5] ss:$0 sm:$0xff] }
  0xa5   :  { %v218_v27 = vadd.f32 %v203_v53, %v156_v49 }
  0xa7   :  { %v250_v29 = vpop.f32.mrf.mxu2 }
  0xa8   :  { %v190_v30 = vpop.f32.mrf.mxu1  ;;  %v260_v26 = vrot.slane %v250_v29, 1 }
  0xa9   :  { %v198_v54 = vrot.slane %v190_v30, 7 }
  0xaa   :  { %v266_v48 = vsel %vm263_vm3, %v259_v40, %v260_v26  ;;  %v149_v57 = vpop.f32.mrf.mxu0 }
  0xab   :  { %v202_v61 = vsel %vm200_vm2, %v197_v44, %v198_v54  ;;  %v157_v0 = vadd.f32 %v547_v24, %v149_v57 }
  0xac   :  { %v215_v2 = vsel %vm827_vm5, %v202_v61, 0.0 }
  0xad   :  { %v219_v5 = vadd.f32 %v215_v2, %v157_v0 }
  0xaf   :  { %v253_v35 = vpop.f32.mrf.mxu2 }
  0xb0   :  { %v193_v36 = vpop.f32.mrf.mxu1  ;;  %v261_v41 = vrot.slane %v253_v35, 1 }
  0xb1   :  { %v199_v39 = vrot.slane %v193_v36, 7 }
  0xb2   :  { %v265_v50 = vsel %vm263_vm3, %v260_v26, %v261_v41  ;;  %v152_v7 = vpop.f32.mrf.mxu0 }
  0xb3   :  { %v204_v42 = vsel %vm200_vm2, %v199_v39, %v196_v25  ;;  %v277_v58 = vsel %vm819_vm4, %v265_v50, 0.0  ;;  %v158_v9 = vadd.f32 %v547_v24, %v152_v7  ;;  %v201_v12 = vsel %vm200_vm2, %v198_v54, %v199_v39 }
  0xb4   :  { %v213_v45 = vsel %vm801_vm1, %v204_v42, 0.0  ;;  %v281_v62 = vadd.f32 %v277_v58, %v218_v27 }
  0xb5   :  { %v217_v47 = vadd.f32 %v213_v45, %v155_v37  ;;  %v220_v15 = vadd.f32 %v201_v12, %v158_v9 }
  0xb6   :  { %v285_v3 = vmax.f32 %v281_v62, 0.0 }
  0xb7   :  { %v280_v51 = vadd.f32 %v266_v48, %v217_v47  ;;  %v256_v59 = vpop.f32.mrf.mxu2 }
  0xb8   :  { %v262_v63 = vrot.slane %v256_v59, 1 }
  0xb9   :  { %v284_v56 = vmax.f32 %v280_v51, 0.0 }
  0xba   :  { %v264_v4 = vsel %vm263_vm3, %v261_v41, %v262_v63  ;;  %v267_v10 = vsel %vm263_vm3, %v262_v63, %v259_v40  ;;  %v362_v18 = vpop.f32.mrf.mxu0 }
  0xbb   :  { %332 = vmatmul.f32.vlgmr.msra.gmra.mxu3 %v284_v56  ;;  %410 = vmatmul.f32.vlgmr.msrb.gmra.mxu1 %v284_v56  ;;  %v282_v8 = vadd.f32 %v264_v4, %v219_v5  ;;  %v279_v14 = vsel %vm840_vm6, %v267_v10, 0.0 }
  0xbc   :  { %472 = vmatmul.f32.vlgmr.msrb.gmra.mxu2 %v284_v56  ;;  %v283_v16 = vadd.f32 %v279_v14, %v220_v15 }
  0xbd   :  { %v286_v13 = vmax.f32 %v282_v8, 0.0 }
  0xbe   :  { %v287_v17 = vmax.f32 %v283_v16, 0.0 }
  0xc2   :  { %v365_v23 = vpop.f32.mrf.mxu0 }
  0xc3   :  { %335 = vmatmul.f32.gmra.mxu3 %v285_v3  ;;  %413 = vmatmul.f32.gmra.mxu1 %v285_v3 }
  0xc4   :  { %475 = vmatmul.f32.gmra.mxu2 %v285_v3 }
  0xca   :  { %v368_v24 = vpop.f32.mrf.mxu0 }
  0xcb   :  { %338 = vmatmul.f32.gmra.mxu3 %v286_v13  ;;  %416 = vmatmul.f32.gmra.mxu1 %v286_v13 }
  0xcc   :  { %478 = vmatmul.f32.gmra.mxu2 %v286_v13 }
  0xd2   :  { %v371_v55 = vpop.f32.mrf.mxu0 }
  0xd3   :  { %341 = vmatmul.f32.gmra.mxu3 %v287_v17  ;;  %419 = vmatmul.f32.gmra.mxu1 %v287_v17 }
  0xd4   :  { %481 = vmatmul.f32.gmra.mxu2 %v287_v17 }
 0x138   :  { %v411_v19 = vpop.f32.mrf.mxu1 }
 0x139   :  { %v423_v25 = vrot.slane %v411_v19, 7 }
 0x13e   :  { %v333_v20 = vpop.f32.mrf.mxu3 }
 0x13f   :  { %v473_v21 = vpop.f32.mrf.mxu2  ;;  %v363_v37 = vadd.f32 %v362_v18, %v333_v20 }
 0x140   :  { %v414_v22 = vpop.f32.mrf.mxu1  ;;  %v485_v51 = vrot.slane %v473_v21, 1 }
 0x141   :  { %v424_v34 = vrot.slane %v414_v22, 7  ;;  %v374_v48 = vadd.f32 %v548_v33, %v363_v37 }
 0x143   :  { %v429_v42 = vsel %vm200_vm2, %v423_v25, %v424_v34 }
 0x146   :  { %v336_v28 = vpop.f32.mrf.mxu3 }
 0x147   :  { %v476_v29 = vpop.f32.mrf.mxu2  ;;  %v366_v32 = vadd.f32 %v365_v23, %v336_v28 }
 0x148   :  { %v417_v30 = vpop.f32.mrf.mxu1  ;;  %v486_v40 = vrot.slane %v476_v29, 1 }
 0x149   :  { %v375_v35 = vadd.f32 %v548_v33, %v366_v32  ;;  %v425_v43 = vrot.slane %v417_v30, 7 }
 0x14a   :  { %v491_v27 = vsel %vm263_vm3, %v485_v51, %v486_v40 }
 0x14b   :  { %v436_v46 = vadd.f32 %v429_v42, %v375_v35  ;;  %v428_v56 = vsel %vm200_vm2, %v424_v34, %v425_v43 }
 0x14c   :  { %v433_v38 = vsel %vm827_vm5, %v428_v56, 0.0 }
 0x14e   :  { %v339_v36 = vpop.f32.mrf.mxu3 }
 0x14f   :  { %v479_v39 = vpop.f32.mrf.mxu2  ;;  %v369_v44 = vadd.f32 %v368_v24, %v339_v36 }
 0x150   :  { %v487_v26 = vrot.slane %v479_v39, 1  ;;  %v420_v41 = vpop.f32.mrf.mxu1 }
 0x151   :  { %v426_v45 = vrot.slane %v420_v41, 7  ;;  %v376_v57 = vadd.f32 %v548_v33, %v369_v44 }
 0x152   :  { %v490_v47 = vsel %vm263_vm3, %v486_v40, %v487_v26 }
 0x153   :  { %v494_v49 = vsel %vm819_vm4, %v490_v47, 0.0  ;;  %v430_v50 = vsel %vm200_vm2, %v426_v45, %v423_v25  ;;  %v437_v0 = vadd.f32 %v433_v38, %v376_v57  ;;  %v427_v2 = vsel %vm200_vm2, %v425_v43, %v426_v45 }
 0x154   :  { %v498_v53 = vadd.f32 %v494_v49, %v436_v46  ;;  %v431_v54 = vsel %vm801_vm1, %v430_v50, 0.0 }
 0x155   :  { %v435_v58 = vadd.f32 %v431_v54, %v374_v48 }
 0x156   :  { %502 = vst [vmem:[%s893_s6 + $0x8] sm:$0xff] %v498_v53  ;;  %v342_v52 = vpop.f32.mrf.mxu3 }
 0x157   :  { %v497_v59 = vadd.f32 %v491_v27, %v435_v58  ;;  %v372_v61 = vadd.f32 %v371_v55, %v342_v52  ;;  %v482_v62 = vpop.f32.mrf.mxu2 }
 0x158   :  { %v488_v63 = vrot.slane %v482_v62, 1 }
 0x159   :  { %501 = vst [vmem:[%s893_s6] sm:$0xff] %v497_v59  ;;  %v377_v1 = vadd.f32 %v548_v33, %v372_v61 }
 0x15a   :  { %v489_v3 = vsel %vm263_vm3, %v487_v26, %v488_v63  ;;  %v492_v4 = vsel %vm263_vm3, %v488_v63, %v485_v51 }
 0x15b   :  { %v438_v5 = vadd.f32 %v427_v2, %v377_v1  ;;  %v499_v6 = vadd.f32 %v489_v3, %v437_v0  ;;  %v496_v60 = vsel %vm840_vm6, %v492_v4, 0.0 }
 0x15d   :  { %v500_v7 = vadd.f32 %v496_v60, %v438_v5  ;;  %503 = vst [vmem:[%s893_s6 + $0x10] sm:$0xff] %v499_v6 }
 0x15f   :  { %504 = vst [vmem:[%s893_s6 + $0x18] sm:$0xff] %v500_v7 }
 0x160   :  { %509 = vsyncpa [#allocation3], 1 }
 0x161   :  { %510 = vsyncpa [#allocation5], 1 }

</bundles_post_ra>
